<compile_context>
chip_gen: v6e
topology: v6e:2x2x1
jax: 0.10.0
libtpu: 0.0.40
codegen_flags: <defaults>
</compile_context>

<pallas_src>
import functools
import math

import jax
import jax.numpy as jnp
from jax.experimental import pallas as pl
from jax.experimental.pallas import tpu as pltpu

PE_SCALE = 1000.0  # deterministic stand-in for hparams['pe_scale']


def _sinusoidal_pos_emb_kernel(freq_sel_ref, phase_ref, x_ref, out_ref, *, pe_scale):
    # freq_sel_ref: (F, F*dim) f32 -- row g holds [freq|freq] in lanes
    #               [g*dim, (g+1)*dim) and exact zeros elsewhere (resident).
    # phase_ref:    (1, F*dim) f32 -- 0 on sin lanes, pi/2 on cos lanes (resident).
    # x_ref:        (tile, F)  f32 -- F positions folded per output row.
    # out_ref:      (tile, F*dim)  -- single lane-dense store.
    fold = x_ref.shape[1]
    xv = x_ref[...]
    freq_sel = freq_sel_ref[...]
    # Sum of per-group broadcast multiplies; off-group lanes contribute an exact
    # +0.0, so every lane carries exactly x*freq (reference multiplication order).
    arg = xv[:, 0:1] * freq_sel[0:1, :]
    for g in range(1, fold):
        arg = arg + xv[:, g:g + 1] * freq_sel[g:g + 1, :]
    # (x*freq)*pe_scale + phase, then one full-width sin and one unmasked store.
    out_ref[...] = jnp.sin(arg * pe_scale + phase_ref[...]).astype(out_ref.dtype)


def _pick_tile(rows: int, lanes: int, vmem_budget_bytes: int = 12 << 20) -> int:
    """Rows per grid step from a VMEM budget (out + lane-padded x, double-buffered)."""
    padded_lanes = pl.cdiv(lanes, 128) * 128              # VMEM lane padding of the out block
    bytes_per_row = 2 * padded_lanes * 4 + 2 * 128 * 4    # out block + lane-padded x block, 2x buffered
    tile = max(8, (vmem_budget_bytes // bytes_per_row) // 8 * 8)
    # Keep >= ~8 grid steps on large inputs so the "parallel" axis can spread
    # across v7x's two TensorCores, but never below 512 rows/step (amortize the
    # ~0.35us per-step pipeline overhead).
    tile = min(tile, max(512, pl.cdiv(pl.cdiv(rows, 8), 8) * 8))
    # Never larger than the (sublane-rounded) row count.
    tile = min(tile, max(8, pl.cdiv(rows, 8) * 8))
    return int(tile)


def sinusoidal_pos_emb(x: jax.Array, dim: int, *, pe_scale: float = PE_SCALE,
                       out_dtype=jnp.float32) -> jax.Array:
    """x: (B,) float positions/timesteps -> (B, dim) [sin | cos] embedding."""
    assert dim % 2 == 0, "dim must be even"
    assert dim >= 4, "dim must be >= 4 (half_dim - 1 divisor)"
    half_dim = dim // 2

    x1d = x.astype(jnp.float32).reshape(-1)
    b = x1d.shape[0]

    # Base frequency vector, constructed exactly like the reference.
    inv = math.log(10000.0) / (half_dim - 1)
    freq = jnp.exp(jnp.arange(half_dim, dtype=jnp.float32) * -inv)       # (half_dim,)
    freq_full = jnp.concatenate([freq, freq])                            # (dim,)
    phase_full = jnp.concatenate(
        [jnp.zeros((half_dim,), jnp.float32),
         jnp.full((half_dim,), math.pi / 2, jnp.float32)])               # (dim,)

    # Lane-dense batch folding for dim < 128: F rows per 128-lane output row.
    fold = 128 // dim if dim < 128 else 1
    if fold < 2 or b % fold != 0:
        # TODO(synk): when dim < 128 and B % (128//dim) != 0 the output block is
        # lane-masked; fusing this op into its consumer would remove that.
        fold = 1
    rows = b // fold
    lanes = fold * dim

    x2d = x1d.reshape(rows, fold)                                        # (rows, F)
    freq_tiled = jnp.tile(freq_full, fold)                               # (lanes,)
    phase_tiled = jnp.tile(phase_full, fold).reshape(1, lanes)           # (1, lanes)
    group = jnp.arange(lanes, dtype=jnp.int32) // dim                    # (lanes,)
    freq_sel = jnp.where(
        group[None, :] == jnp.arange(fold, dtype=jnp.int32)[:, None],
        freq_tiled[None, :], 0.0).astype(jnp.float32)                    # (fold, lanes)

    tile = _pick_tile(rows, lanes)
    grid = (pl.cdiv(rows, tile),)

    out = pl.pallas_call(
        functools.partial(_sinusoidal_pos_emb_kernel, pe_scale=float(pe_scale)),
        out_shape=jax.ShapeDtypeStruct((rows, lanes), out_dtype),
        grid=grid,
        in_specs=[
            pl.BlockSpec((fold, lanes), lambda i: (0, 0)),   # freq selector (resident)
            pl.BlockSpec((1, lanes), lambda i: (0, 0)),      # phase vector (resident)
            pl.BlockSpec((tile, fold), lambda i: (i, 0)),    # folded positions
        ],
        out_specs=pl.BlockSpec((tile, lanes), lambda i: (i, 0)),
        compiler_params=pltpu.CompilerParams(
            dimension_semantics=("parallel",),
            vmem_limit_bytes=32 << 20,   # safe on v5e/v6e; v7x physical VMEM is 64 MiB
        ),
    )(freq_sel, phase_tiled, x2d)

    # Zero-cost row-major view back to (B, dim).
    return out.reshape(b, dim)


def _reference(x: jax.Array, dim: int, pe_scale: float = PE_SCALE) -> jax.Array:
    half_dim = dim // 2
    emb = math.log(10000.0) / (half_dim - 1)
    emb = jnp.exp(jnp.arange(half_dim, dtype=jnp.float32) * -emb)
    emb = x.astype(jnp.float32)[:, None] * emb[None, :] * pe_scale
    return jnp.concatenate([jnp.sin(emb), jnp.cos(emb)], axis=-1)


if __name__ == "__main__":
    key = jax.random.PRNGKey(0)
    B = 8
    x = jax.random.uniform(key, (B,), dtype=jnp.float32)   # diffusion timesteps in [0, 1)

    # cos(t) is evaluated as sin(t + pi/2); with pe_scale=1000 the arguments
    # reach ~1e3, so f32 rounding of the phase add / range reduction gives
    # deviations up to ~|t|*2^-24 ~ 6e-5 vs the reference cos.  The sin half
    # uses the reference multiplication order exactly, so atol below is
    # dominated by that phase rounding (plus margin for the hardware sin impl).
    for dim in (32, 128):   # 32 exercises the lane-dense batch fold, 128 the plain path
        out = jax.block_until_ready(sinusoidal_pos_emb(x, dim))
        ref = _reference(x, dim)
        assert out.shape == (B, dim)
        assert jnp.allclose(out, ref, atol=5e-4, rtol=1e-5), f"mismatch vs reference (dim={dim})"

    print("KERNEL_OK")
</pallas_src>

<mosaic_0001>
module attributes {stable_mosaic.version = 11 : i64} {
  func.func @_sinusoidal_pos_emb_kernel(%arg0: i32, %arg1: memref<4x128xf32, #tpu.memory_space<vmem>>, %arg2: memref<1x128xf32, #tpu.memory_space<vmem>>, %arg3: memref<8x4xf32, #tpu.memory_space<vmem>>, %arg4: memref<8x128xf32, #tpu.memory_space<vmem>>) attributes {dimension_semantics = [#tpu.dimension_semantics<parallel>], iteration_bounds = array<i64: 1>, scalar_prefetch = 0 : i64, scratch_operands = 0 : i64, tpu.core_type = #tpu.core_type<tc>, window_params = [{pipeline_mode = #tpu.pipeline_mode<synchronous>, transform_indices = @transform_0, window_bounds = array<i64: 4, 128>}, {pipeline_mode = #tpu.pipeline_mode<synchronous>, transform_indices = @transform_1, window_bounds = array<i64: 1, 128>}, {transform_indices = @transform_2, window_bounds = array<i64: 8, 4>}, {transform_indices = @transform_3, window_bounds = array<i64: 8, 128>}]} {
    %c0 = arith.constant 0 : index
    %c0_0 = arith.constant 0 : index
    %0 = vector.load %arg3[%c0, %c0_0] : memref<8x4xf32, #tpu.memory_space<vmem>>, vector<8x4xf32>
    %c0_1 = arith.constant 0 : index
    %c0_2 = arith.constant 0 : index
    %1 = vector.load %arg1[%c0_1, %c0_2] : memref<4x128xf32, #tpu.memory_space<vmem>>, vector<4x128xf32>
    %2 = vector.extract_strided_slice %0 {offsets = [0, 0], sizes = [8, 1], strides = [1, 1]} : vector<8x4xf32> to vector<8x1xf32>
    %3 = vector.extract_strided_slice %1 {offsets = [0, 0], sizes = [1, 128], strides = [1, 1]} : vector<4x128xf32> to vector<1x128xf32>
    %4 = vector.broadcast %2 : vector<8x1xf32> to vector<8x128xf32>
    %5 = vector.broadcast %3 : vector<1x128xf32> to vector<8x128xf32>
    %6 = arith.mulf %4, %5 : vector<8x128xf32>
    %7 = vector.extract_strided_slice %0 {offsets = [0, 1], sizes = [8, 1], strides = [1, 1]} : vector<8x4xf32> to vector<8x1xf32>
    %8 = vector.extract_strided_slice %1 {offsets = [1, 0], sizes = [1, 128], strides = [1, 1]} : vector<4x128xf32> to vector<1x128xf32>
    %9 = vector.broadcast %7 : vector<8x1xf32> to vector<8x128xf32>
    %10 = vector.broadcast %8 : vector<1x128xf32> to vector<8x128xf32>
    %11 = arith.mulf %9, %10 : vector<8x128xf32>
    %12 = arith.addf %6, %11 : vector<8x128xf32>
    %13 = vector.extract_strided_slice %0 {offsets = [0, 2], sizes = [8, 1], strides = [1, 1]} : vector<8x4xf32> to vector<8x1xf32>
    %14 = vector.extract_strided_slice %1 {offsets = [2, 0], sizes = [1, 128], strides = [1, 1]} : vector<4x128xf32> to vector<1x128xf32>
    %15 = vector.broadcast %13 : vector<8x1xf32> to vector<8x128xf32>
    %16 = vector.broadcast %14 : vector<1x128xf32> to vector<8x128xf32>
    %17 = arith.mulf %15, %16 : vector<8x128xf32>
    %18 = arith.addf %12, %17 : vector<8x128xf32>
    %19 = vector.extract_strided_slice %0 {offsets = [0, 3], sizes = [8, 1], strides = [1, 1]} : vector<8x4xf32> to vector<8x1xf32>
    %20 = vector.extract_strided_slice %1 {offsets = [3, 0], sizes = [1, 128], strides = [1, 1]} : vector<4x128xf32> to vector<1x128xf32>
    %21 = vector.broadcast %19 : vector<8x1xf32> to vector<8x128xf32>
    %22 = vector.broadcast %20 : vector<1x128xf32> to vector<8x128xf32>
    %23 = arith.mulf %21, %22 : vector<8x128xf32>
    %24 = arith.addf %18, %23 : vector<8x128xf32>
    %cst = arith.constant 1.000000e+03 : f32
    %25 = vector.broadcast %cst : f32 to vector<8x128xf32>
    %26 = arith.mulf %24, %25 : vector<8x128xf32>
    %c0_3 = arith.constant 0 : index
    %c0_4 = arith.constant 0 : index
    %27 = vector.load %arg2[%c0_3, %c0_4] : memref<1x128xf32, #tpu.memory_space<vmem>>, vector<1x128xf32>
    %28 = vector.broadcast %27 : vector<1x128xf32> to vector<8x128xf32>
    %29 = arith.addf %26, %28 : vector<8x128xf32>
    %30 = math.sin %29 : vector<8x128xf32>
    %c0_5 = arith.constant 0 : index
    %c0_6 = arith.constant 0 : index
    %31 = vector.load %arg4[%c0_5, %c0_6] : memref<8x128xf32, #tpu.memory_space<vmem>>, vector<8x128xf32>
    tpu.vector_store %arg4[%c0_5, %c0_6], %30 {strides = array<i32>} : memref<8x128xf32, #tpu.memory_space<vmem>>, vector<8x128xf32>,
    return
  }
  func.func @transform_0(%arg0: i32) -> (i32, i32) {
    %c0_i32 = arith.constant 0 : i32
    %c0_i32_0 = arith.constant 0 : i32
    %c0_i32_1 = arith.constant 0 : i32
    return %c0_i32, %c0_i32_0 : i32, i32
  }
  func.func @transform_1(%arg0: i32) -> (i32, i32) {
    %c0_i32 = arith.constant 0 : i32
    %c0_i32_0 = arith.constant 0 : i32
    %c0_i32_1 = arith.constant 0 : i32
    return %c0_i32, %c0_i32_0 : i32, i32
  }
  func.func @transform_2(%arg0: i32) -> (i32, i32) {
    %c0_i32 = arith.constant 0 : i32
    %c0_i32_0 = arith.constant 0 : i32
    return %arg0, %c0_i32 : i32, i32
  }
  func.func @transform_3(%arg0: i32) -> (i32, i32) {
    %c0_i32 = arith.constant 0 : i32
    %c0_i32_0 = arith.constant 0 : i32
    return %arg0, %c0_i32 : i32, i32
  }
}

</mosaic_0001>

<bundles_post_ra>
// kernel: tpu_custom_call.1
= control target key start
LH: loop header
LB: loop body
LE: loop exit
PB: predicated region body
PF: predicated region fallthrough
CT: control target
= control target key end

     0   :  { %8 = vsyncpa [#allocation3], 0  ;;  %s343_s0 = inlined_call_operand.hbm [shape: f32[4,128], index: 0, kind: input, shape index: {}]   ;;  %s344_s1 = inlined_call_operand.vmem [shape: f32[1,128], index: 1, kind: input, shape index: {}]   ;;  %s345_s2 = inlined_call_operand.vmem [shape: f32[2,4], index: 2, kind: input, shape index: {}]   ;;  %s346_s3 = inlined_call_operand.hbm [shape: f32[2,128], index: 3, kind: output, shape index: {}]  }
   0x1   :  { %9 = vsyncpa [#allocation4], 0  ;;  %s276_s12 = smov [#allocation2]  }
   0x2   :  { %s16_s13 = sshll.u32 %s276_s12, 4  ;;  %s17_s13 = int_to_ptr.vmem [resolvable:$true] %s16_s13 }
   0x3   :  { %s240_s14 = scalar_lea.vmem %s17_s13, 64  ;;  %p245_p1 = scmp.lt.s32.totalorder %s17_s13, %s17_s13 }
   0x4   :  { %p241_p0 = scmp.ne.s32.totalorder %s17_s13, %s240_s14  ;;  %p246_p2 = scmp.lt.s32.totalorder %s240_s14, %s240_s14 }
   0x6   :  { %p247_p3 = por %p246_p2, %p245_p1 }
   0x8   :  { %p248_p4 = pnand %p247_p3, %p241_p0 }
   0xa   :  { %251 = shalt.err (!%p248_p4)
}
   0xb   :  { %19 = dma.hbm_to_vmem [thread:$0]  %s343_s0, 64, %s17_s13, [#allocation3]  }
   0xc   :  { %272 = dma.done.wait [#allocation3], 64  }
   0xd   :  { %273 = vsyncadd [#allocation3], 4294967232  ;;  %v277_v0 = vmov 0   ;;  %v278_v1 = vmov 2   ;;  %v27_v2 = vld [vmem:[%s345_s2] sm:$0xff]  ;;  %v279_v3 = vmov 1   ;;  %v34_v5 = vlaneseq }
   0xe   :  { %223 = vset.pattern.permute.xlu0 %v277_v0  ;;  %225 = vset.pattern.permute.xlu1 %v278_v1  ;;  %v280_v4 = vmov 3   ;;  %v28_v9 = vld [vmem:[#allocation2] sm:$0xf]  ;;  %v281_v40 = vmov 683565275  }
   0xf   :  { %31 = vperm.xlu0 %223, %v27_v2   ;;  %50 = vperm.xlu1 %225, %v27_v2   ;;  %v35_v6 = vshrl.u32 %v34_v5, 7  ;;  %v200_v27 = vld [vmem:[%s344_s1] ss:$0 sm:$0xff]  ;;  %v282_v42 = vmov 2475754826  }
  0x10   :  { %v283_v45 = vmov 2131351028   ;;  %v284_v48 = vmov 2102212464   ;;  %v285_v51 = vmov 920167782  }
  0x11   :  { %v36_v7 = vsub.s32 0, %v35_v6  ;;  %v45_v8 = vsub.s32 1, %v35_v6  ;;  %v55_v11 = vsub.s32 2, %v35_v6  ;;  %v65_v13 = vsub.s32 3, %v35_v6 }
  0x12   :  { %v286_v54 = vmov 1326507024  }
  0x13   :  { %224 = vset.pattern.permute.xlu0 %v279_v3  ;;  %226 = vset.pattern.permute.xlu1 %v280_v4  ;;  %v37_v14 = vrot.slane %v28_v9, %v36_v7  ;;  %v46_v15 = vrot.slane %v28_v9, %v45_v8  ;;  %v56_v16 = vrot.slane %v28_v9, %v55_v11 }
  0x14   :  { %40 = vperm.xlu0 %224, %v27_v2   ;;  %60 = vperm.xlu1 %226, %v27_v2   ;;  %v66_v17 = vrot.slane %v28_v9, %v65_v13 }
  0x18   :  { %227 = vset.pattern.permute.xlu0 %v280_v4 }
  0x8a   :  { %v32_v10 = vpop.permute.xlu0 %31  ;;  %v51_v12 = vpop.permute.xlu1 %50 }
  0x8b   :  { %v38_v20 = vmul.f32 %v37_v14, %v32_v10  ;;  %v57_v22 = vmul.f32 %v56_v16, %v51_v12 }
  0x8f   :  { %v41_v18 = vpop.permute.xlu0 %40  ;;  %v61_v19 = vpop.permute.xlu1 %60 }
  0x90   :  { %v47_v21 = vmul.f32 %v46_v15, %v41_v18  ;;  %v67_v24 = vmul.f32 %v66_v17, %v61_v19 }
  0x92   :  { %v48_v23 = vadd.f32 %v47_v21, %v38_v20 }
  0x94   :  { %v58_v25 = vadd.f32 %v57_v22, %v48_v23 }
  0x96   :  { %v68_v26 = vadd.f32 %v67_v24, %v58_v25 }
  0x98   :  { %v69_v28 = vmul.f32 1000.0, %v68_v26 }
  0x9a   :  { %v319_v29 = vadd.f32 %v200_v27, %v69_v28 }
  0x9c   :  { %v81_v30 = vand.u32 2139095040, %v319_v29  ;;  %v78_v34 = vand.u32 2147483647, %v319_v29  ;;  %vm80_vm7 = vcmp.lt.s32.totalorder %v319_v29, 0  ;;  %vm170_vm12 = vweird.f32 %v319_v29 }
  0x9e   :  { %v82_v31 = vshrl.u32 %v81_v30, 23  ;;  %v85_v37 = vand.u32 8388607, %v78_v34  ;;  %vm79_vm8 = vcmp.le.f32.partialorder %v78_v34, 0.7853982 }
  0xa0   :  { %v201_v32 = vadd.s32 4294967169, %v82_v31  ;;  %v86_v56 = vor.u32 8388608, %v85_v37 }
  0xa2   :  { %v88_v33 = vadd.s32 1, %v201_v32  ;;  %v126_v6 = vshll.u32 %v86_v56, 8 }
  0xa4   :  { %vm89_vm0 = vcmp.gt.s32.totalorder %v88_v33, 0 }
  0xa5   :  { %v90_v35 = vsel %vm89_vm0, %v88_v33, 0 }
  0xa6   :  { %v92_v36 = vand.u32 31, %v90_v35  ;;  %v91_v39 = vshrl.u32 %v90_v35, 5 }
  0xa8   :  { %v93_v38 = vsub.s32 32, %v92_v36  ;;  %v95_v41 = vshll.u32 %v281_v40, %v92_v36  ;;  %v98_v43 = vshll.u32 %v282_v42, %v92_v36  ;;  %v101_v47 = vshll.u32 %v283_v45, %v92_v36 }
  0xa9   :  { %v104_v50 = vshll.u32 %v284_v48, %v92_v36  ;;  %v107_v53 = vshll.u32 %v285_v51, %v92_v36  ;;  %vm110_vm1 = vcmp.lt.s32.totalorder %v91_v39, 1  ;;  %vm113_vm2 = vcmp.lt.s32.totalorder %v91_v39, 4 }
  0xaa   :  { %v96_v44 = vshrl.u32 %v282_v42, %v93_v38  ;;  %v99_v46 = vshrl.u32 %v283_v45, %v93_v38  ;;  %v102_v49 = vshrl.u32 %v284_v48, %v93_v38  ;;  %v105_v52 = vshrl.u32 %v285_v51, %v93_v38 }
  0xab   :  { %v108_v55 = vshrl.u32 %v286_v54, %v93_v38  ;;  %v94_v1 = vshrl.u32 %v281_v40, %v93_v38  ;;  %vm112_vm3 = vcmp.lt.s32.totalorder %v91_v39, 3  ;;  %vm111_vm4 = vcmp.lt.s32.totalorder %v91_v39, 2 }
  0xac   :  { %v97_v57 = vor.u32 %v96_v44, %v95_v41  ;;  %v100_v58 = vor.u32 %v99_v46, %v98_v43  ;;  %v103_v59 = vor.u32 %v102_v49, %v101_v47  ;;  %v106_v60 = vor.u32 %v105_v52, %v104_v50 }
  0xad   :  { %v109_v61 = vor.u32 %v108_v55, %v107_v53 }
  0xae   :  { %v115_v62 = vsel %vm113_vm2, %v103_v59, 2102212464  ;;  %v118_v63 = vsel %vm110_vm1, %v97_v57, %v100_v58  ;;  %v122_v0 = vsel %vm110_vm1, %v100_v58, %v103_v59  ;;  %v119_v2 = vsel %vm113_vm2, %v106_v60, 920167782 }
  0xaf   :  { %v123_v3 = vsel %vm113_vm2, %v109_v61, 1326507024  ;;  %v120_v4 = vsel %vm112_vm3, %v103_v59, %v119_v2  ;;  %v114_v7 = vsel %vm110_vm1, %v94_v1, %v97_v57  ;;  %v116_v8 = vsel %vm112_vm3, %v100_v58, %v115_v62 }
  0xb0   :  { %v124_v5 = vsel %vm112_vm3, %v106_v60, %v123_v3  ;;  %v121_v9 = vsel %vm111_vm4, %v118_v63, %v120_v4  ;;  %v117_v15 = vsel %vm111_vm4, %v114_v7, %v116_v8 }
  0xb1   :  { %v125_v10 = vsel %vm111_vm4, %v122_v0, %v124_v5  ;;  %v328_v13 = vmul.u32.u64.low %v126_v6, %v121_v9  ;;  %v329_v14 = vmul.u32.u64.high %v126_v6, %v121_v9, %v328_v13  ;;  %v133_v17 = vmul.u32 %v126_v6, %v117_v15 }
  0xb2   :  { %v325_v11 = vmul.u32.u64.low %v126_v6, %v125_v10  ;;  %v326_v12 = vmul.u32.u64.high %v126_v6, %v125_v10, %v325_v11 }
  0xb3   :  { %v136_v16 = vadd.s32 1, %v329_v14 }
  0xb4   :  { %vm135_vm5 = vc.u32 %v326_v12, %v328_v13  ;;  %v134_v30 = vadd.s32 %v328_v13, %v326_v12 }
  0xb5   :  { %v137_v18 = vsel %vm135_vm5, %v136_v16, %v329_v14 }
  0xb6   :  { %v138_v19 = vadd.s32 %v137_v18, %v133_v17 }
  0xb8   :  { %v139_v20 = vadd.s32 536870912, %v138_v19 }
  0xba   :  { %v140_v21 = vshrl.u32 %v139_v20, 30 }
  0xbc   :  { %v141_v22 = vshll.u32 %v140_v21, 30  ;;  %v164_v44 = vsub.s32 4, %v140_v21 }
  0xbe   :  { %v142_v23 = vsub.s32 %v138_v19, %v141_v22  ;;  %v165_v47 = vsel %vm80_vm7, %v164_v44, %v140_v21 }
  0xbf   :  { %v167_v48 = vsel %vm79_vm8, 0, %v165_v47 }
  0xc0   :  { %v144_v24 = vsub.s32 0, %v142_v23  ;;  %v171_v49 = vadd.s32 3, %v167_v48 }
  0xc2   :  { %v202_v25 = vmin.u32 %v144_v24, %v142_v23  ;;  %v172_v50 = vand.u32 3, %v171_v49 }
  0xc4   :  { %v146_v26 = vclz %v202_v25  ;;  %vm177_vm9 = vcmp.eq.s32.totalorder %v172_v50, 2  ;;  %vm174_vm10 = vcmp.eq.s32.totalorder %v172_v50, 0  ;;  %vm173_vm11 = vcmp.lt.s32.totalorder %v172_v50, 2 }
  0xc6   :  { %v203_v27 = vadd.s32 4294967294, %v146_v26 }
  0xc8   :  { %vm204_vm6 = vcmp.lt.s32.totalorder %v203_v27, 0 }
  0xc9   :  { %v149_v28 = vsel %vm204_vm6, 0, %v203_v27 }
  0xca   :  { %v150_v31 = vsub.s32 32, %v149_v28  ;;  %v154_v32 = vsub.s32 4294967266, %v149_v28  ;;  %v151_v33 = vshll.u32 %v142_v23, %v149_v28 }
  0xcc   :  { %v152_v35 = vshrl.u32 %v134_v30, %v150_v31  ;;  %v155_v36 = vadd.s32 127, %v154_v32 }
  0xce   :  { %v153_v37 = vor.u32 %v152_v35, %v151_v33  ;;  %v156_v38 = vshll.u32 %v155_v36, 23 }
  0xd0   :  { %v157_v39 = vor.u32 4788187, %v156_v38  ;;  %v160_v41 = vcvt.s32.f32 %v153_v37 }
  0xd2   :  { %v158_v40 = vand.u32 2147483647, %v157_v39 }
  0xd4   :  { %v161_v42 = vmul.f32 %v160_v41, %v158_v40 }
  0xd6   :  { %v162_v43 = vxor.u32 2147483648, %v161_v42 }
  0xd8   :  { %v163_v45 = vsel %vm80_vm7, %v162_v43, %v161_v42 }
  0xd9   :  { %v166_v46 = vsel %vm79_vm8, %v319_v29, %v163_v45 }
  0xda   :  { %228 = vcosq.f32 %v166_v46 }
  0xdb   :  { %230 = vsinq.f32 %v166_v46 }
  0xe7   :  { %v229_v51 = vpop.eup %228 }
  0xe8   :  { %v231_v52 = vpop.eup %230  ;;  %v178_v53 = vxor.u32 2147483648, %v229_v51 }
  0xe9   :  { %v175_v54 = vxor.u32 2147483648, %v231_v52 }
  0xea   :  { %v179_v55 = vsel %vm177_vm9, %v178_v53, %v231_v52 }
  0xeb   :  { %v176_v56 = vsel %vm174_vm10, %v229_v51, %v175_v54 }
  0xec   :  { %v180_v34 = vsel %vm173_vm11, %v176_v56, %v179_v55 }
  0xed   :  { %v181_v57 = vsel %vm170_vm12, nan, %v180_v34 }
  0xee   :  { %182 = vst [vmem:[#allocation5] sm:$0xff] %v181_v57 }
  0xef   :  { %187 = vsyncadd [#allocation4], 96  ;;  %s287_s1 = smov [#allocation5]  }
  0xf0   :  { %s188_s19 = sshll.u32 %s287_s1, 4  ;;  %s189_s19 = int_to_ptr.vmem [resolvable:$true] %s188_s19 }
  0xf1   :  { %s252_s20 = scalar_lea.vmem %s189_s19, 32  ;;  %s256_s21 = scalar_lea.vmem %s189_s19, 128 }
  0xf2   :  { %p253_p5 = scmp.ne.s32.totalorder %s189_s19, %s252_s20  ;;  %p257_p6 = scmp.lt.s32.totalorder %s189_s19, %s189_s19 }
  0xf3   :  { %p258_p7 = scmp.lt.s32.totalorder %s256_s21, %s252_s20 }
  0xf5   :  { %p259_p8 = por %p258_p7, %p257_p6 }
  0xf7   :  { %p260_p9 = pnand %p259_p8, %p253_p5 }
  0xf9   :  { %263 = shalt.err (!%p260_p9)
}
  0xfa   :  { %s288_s22 = smov 32   ;;  %s289_s23 = smov 2  }
  0xfb   :  { %194 = dma.vmem_to_hbm [thread:$0]  %s189_s19, 32, %s346_s3, [#allocation4], %s288_s22, %s288_s22, %s289_s23  }
  0xfc   :  { %274 = dma.done.wait [#allocation4], 128  }
  0xfd   :  { %275 = vsyncadd [#allocation4], 4294967168 }
  0xfe   :  { %198 = vsyncpa [#allocation3], 1 }
  0xff   :  { %199 = vsyncpa [#allocation4], 1 }

</bundles_post_ra>
